<compile_context>
chip_gen: v7x
topology: tpu7x:2x2x1
jax: 0.10.0
libtpu: 0.0.40
codegen_flags: <defaults>
</compile_context>

<pallas_src>
import jax
import jax.numpy as jnp
from jax import lax
from jax.experimental import pallas as pl
from jax.experimental.pallas import tpu as pltpu


def _round_up(x, m):
    return ((x + m - 1) // m) * m


def dann_forward_kernel(x_ref, w1_ref, b1_ref, w2t_ref, b2t_ref, out_ref):
    # x_ref:   (TB, IN_P)     streamed batch tile
    # w1_ref:  (IN_P, HID_P)  feature_extractor weight, resident in VMEM
    # b1_ref:  (1, HID_P)     feature_extractor bias, resident
    # w2t_ref: (CLS8, HID_P)  classifier weight, pre-transposed, CLS padded to 8 sublanes
    # b2t_ref: (CLS8, 1)      classifier bias (column), resident
    # out_ref: (CLS8, TB)     transposed logits, lane-dense along the batch axis
    x = x_ref[...]
    h = jnp.dot(x, w1_ref[...], preferred_element_type=jnp.float32) + b1_ref[...]
    h = jax.nn.sigmoid(h)  # feature_extractor Sigmoid
    # classifier emitted transposed: logits^T[c, b] = sum_k w2t[c, k] * h[b, k]
    # (dot_general contracts the hidden axis; no explicit transpose of h needed).
    logits_t = lax.dot_general(
        w2t_ref[...], h,
        dimension_numbers=(((1,), (1,)), ((), ())),
        preferred_element_type=jnp.float32,
    )  # (CLS8, TB)
    out_ref[...] = (logits_t + b2t_ref[...]).astype(out_ref.dtype)


def dann_forward(x, w1, b1, w2, b2, *, batch_tile=2048, stream_bf16=False):
    B, IN = x.shape
    HID = w1.shape[1]
    CLS = w2.shape[1]

    # ---- hardware-friendly padded feature shapes ----
    IN_P = _round_up(IN, 128)            # 768 -> 768 (no pad needed for the default)
    HID_P = _round_up(HID, 128)          # 25  -> 128
    CLS8 = _round_up(max(CLS, 8), 8)     # 2   -> 8 (sublane-padded, transposed output)

    stream_dtype = jnp.bfloat16 if stream_bf16 else jnp.float32
    sd = jnp.dtype(stream_dtype).itemsize

    # ---- batch tiling ----
    # Small batches: one full-array block (block == full dim satisfies layout rules).
    # Larger batches: tile must be a multiple of 128 (lane-dense transposed output)
    # and chosen so the grid has >= 2 steps (v7x megacore); tail block is partial.
    if B <= 256:
        tb = B
    else:
        tb = min(_round_up(batch_tile, 128), _round_up(pl.cdiv(B, 2), 128))
        tb = max(tb, 128)
    grid = (pl.cdiv(B, tb),)

    # ---- inputs: avoid any copy of x unless strictly required ----
    x_in = x
    if x_in.dtype != stream_dtype:
        x_in = x_in.astype(stream_dtype)
    if IN_P != IN:
        x_in = jnp.pad(x_in, ((0, 0), (0, IN_P - IN)))

    # Tiny one-off weight/bias padding. Zero padding keeps the math exact: padded
    # hidden units see sigmoid(0)=0.5 but multiply zero columns of w2^T; padded
    # class rows are all-zero and sliced away by the wrapper.
    w1_p = jnp.pad(w1.astype(stream_dtype), ((0, IN_P - IN), (0, HID_P - HID)))
    b1_p = jnp.pad(b1.reshape(1, HID).astype(jnp.float32), ((0, 0), (0, HID_P - HID)))
    w2t_p = jnp.pad(w2.T.astype(jnp.float32), ((0, CLS8 - CLS), (0, HID_P - HID)))
    b2t_p = jnp.pad(b2.reshape(CLS, 1).astype(jnp.float32), ((0, CLS8 - CLS), (0, 0)))

    # Advisory cost estimate (two small GEMMs + sigmoid; HBM-bound on x).
    cost = pl.CostEstimate(
        flops=2 * B * (IN_P * HID_P + HID_P * CLS8),
        transcendentals=B * HID_P,
        bytes_accessed=(B * IN_P * sd + IN_P * HID_P * sd
                        + (HID_P + CLS8 * HID_P + CLS8) * 4
                        + CLS8 * B * 4),
    )

    # Explicit scoped-VMEM budget: 2-deep x tiles + resident weights + transposed
    # out tiles + intermediates, with headroom. >=32 MiB (v5e default is only 16),
    # capped at 60 MiB so it is valid on v7x's 64 MiB physical VMEM.
    vmem_est = (2 * tb * IN_P * sd
                + 2 * IN_P * HID_P * sd
                + 2 * CLS8 * tb * 4
                + 4 * tb * HID_P * 4
                + (2 << 20))
    vmem_limit = int(min(max(vmem_est, 32 << 20), 60 << 20))

    out_t = pl.pallas_call(
        dann_forward_kernel,
        out_shape=jax.ShapeDtypeStruct((CLS8, B), jnp.float32),
        grid_spec=pltpu.PrefetchScalarGridSpec(
            num_scalar_prefetch=0,
            grid=grid,
            in_specs=[
                pl.BlockSpec((tb, IN_P), lambda i: (i, 0)),       # x tile (streamed)
                pl.BlockSpec((IN_P, HID_P), lambda i: (0, 0)),    # w1   (resident)
                pl.BlockSpec((1, HID_P), lambda i: (0, 0)),       # b1   (resident)
                pl.BlockSpec((CLS8, HID_P), lambda i: (0, 0)),    # w2^T (resident)
                pl.BlockSpec((CLS8, 1), lambda i: (0, 0)),        # b2^T (resident)
            ],
            out_specs=pl.BlockSpec((CLS8, tb), lambda i: (0, i)),
        ),
        compiler_params=pltpu.CompilerParams(
            dimension_semantics=("parallel",),   # megacore-shard the batch tiles
            vmem_limit_bytes=vmem_limit,
        ),
        cost_estimate=cost,
    )(x_in, w1_p, b1_p, w2t_p, b2t_p)

    # Tiny (CLS, B) -> (B, CLS) slice + transpose of the real class rows only.
    return out_t[:CLS, :].T


def init_params(key, input_size=768, hidden=25, cls_num=2):
    # Deterministic init mimicking PyTorch Linear default: U(-1/sqrt(fan_in), +1/sqrt(fan_in)).
    k1, k2, k3, k4 = jax.random.split(key, 4)
    bound1 = 1.0 / (input_size ** 0.5)
    bound2 = 1.0 / (hidden ** 0.5)
    w1 = jax.random.uniform(k1, (input_size, hidden), jnp.float32, -bound1, bound1)
    b1 = jax.random.uniform(k2, (hidden,), jnp.float32, -bound1, bound1)
    w2 = jax.random.uniform(k3, (hidden, cls_num), jnp.float32, -bound2, bound2)
    b2 = jax.random.uniform(k4, (cls_num,), jnp.float32, -bound2, bound2)
    return w1, b1, w2, b2


if __name__ == "__main__":
    INPUT_SIZE = 768   # module default
    HIDDEN = 25        # hidden_layer_size default
    CLS_NUM = 2        # cls_num default
    BATCH = 16         # small test batch

    key = jax.random.PRNGKey(0)
    kx, kp = jax.random.split(key)
    x = jax.random.normal(kx, (BATCH, INPUT_SIZE), dtype=jnp.float32)
    w1, b1, w2, b2 = init_params(kp, INPUT_SIZE, HIDDEN, CLS_NUM)

    out = dann_forward(x, w1, b1, w2, b2)
    out = jax.block_until_ready(out)

    # Pure-JAX reference check (unpadded math)
    ref = jax.nn.sigmoid(x @ w1 + b1) @ w2 + b2
    assert out.shape == (BATCH, CLS_NUM)
    assert jnp.allclose(out, ref, atol=1e-5, rtol=1e-5)

    # TODO(synk): training-side machinery (RevGrad, domain_classifier, Adam loop) is
    # outside the forward() spec and intentionally not implemented as kernels.

    print("KERNEL_OK")
</pallas_src>

<mosaic_0001>
module attributes {stable_mosaic.version = 11 : i64} {
  func.func @dann_forward_kernel(%arg0: i32, %arg1: memref<16x768xf32, #tpu.memory_space<vmem>>, %arg2: memref<768x128xf32, #tpu.memory_space<vmem>>, %arg3: memref<1x128xf32, #tpu.memory_space<vmem>>, %arg4: memref<8x128xf32, #tpu.memory_space<vmem>>, %arg5: memref<8x1xf32, #tpu.memory_space<vmem>>, %arg6: memref<8x16xf32, #tpu.memory_space<vmem>>) attributes {dimension_semantics = [#tpu.dimension_semantics<parallel>], iteration_bounds = array<i64: 1>, scalar_prefetch = 0 : i64, scratch_operands = 0 : i64, tpu.core_type = #tpu.core_type<tc>, window_params = [{transform_indices = @transform_0, window_bounds = array<i64: 16, 768>}, {pipeline_mode = #tpu.pipeline_mode<synchronous>, transform_indices = @transform_1, window_bounds = array<i64: 768, 128>}, {pipeline_mode = #tpu.pipeline_mode<synchronous>, transform_indices = @transform_2, window_bounds = array<i64: 1, 128>}, {pipeline_mode = #tpu.pipeline_mode<synchronous>, transform_indices = @transform_3, window_bounds = array<i64: 8, 128>}, {pipeline_mode = #tpu.pipeline_mode<synchronous>, transform_indices = @transform_4, window_bounds = array<i64: 8, 1>}, {transform_indices = @transform_5, window_bounds = array<i64: 8, 16>}]} {
    %c0 = arith.constant 0 : index
    %c0_0 = arith.constant 0 : index
    %0 = vector.load %arg1[%c0, %c0_0] : memref<16x768xf32, #tpu.memory_space<vmem>>, vector<16x768xf32>
    %c0_1 = arith.constant 0 : index
    %c0_2 = arith.constant 0 : index
    %1 = vector.load %arg2[%c0_1, %c0_2] : memref<768x128xf32, #tpu.memory_space<vmem>>, vector<768x128xf32>
    %cst = arith.constant dense<0.000000e+00> : vector<16x128xf32>
    %2 = tpu.matmul %0, %1, %cst {dimension_numbers = #tpu.dot_dimension_numbers<[1], [0], [0], [1], [0, 0, 1, 1], [], []>} : vector<16x768xf32>, vector<768x128xf32>, vector<16x128xf32> -> vector<16x128xf32>
    %c0_3 = arith.constant 0 : index
    %c0_4 = arith.constant 0 : index
    %3 = vector.load %arg3[%c0_3, %c0_4] : memref<1x128xf32, #tpu.memory_space<vmem>>, vector<1x128xf32>
    %4 = vector.broadcast %3 : vector<1x128xf32> to vector<16x128xf32>
    %5 = arith.addf %2, %4 : vector<16x128xf32>
    %6 = arith.negf %5 : vector<16x128xf32>
    %7 = math.exp %6 : vector<16x128xf32>
    %cst_5 = arith.constant 1.000000e+00 : f32
    %8 = vector.broadcast %cst_5 : f32 to vector<16x128xf32>
    %9 = arith.addf %8, %7 : vector<16x128xf32>
    %10 = arith.divf %8, %9 : vector<16x128xf32>
    %c0_6 = arith.constant 0 : index
    %c0_7 = arith.constant 0 : index
    %11 = vector.load %arg4[%c0_6, %c0_7] : memref<8x128xf32, #tpu.memory_space<vmem>>, vector<8x128xf32>
    %cst_8 = arith.constant dense<0.000000e+00> : vector<8x16xf32>
    %12 = tpu.matmul %11, %10, %cst_8 {dimension_numbers = #tpu.dot_dimension_numbers<[1], [1], [0], [0], [0, 0, 1, 0], [], []>} : vector<8x128xf32>, vector<16x128xf32>, vector<8x16xf32> -> vector<8x16xf32>
    %c0_9 = arith.constant 0 : index
    %c0_10 = arith.constant 0 : index
    %13 = vector.load %arg5[%c0_9, %c0_10] : memref<8x1xf32, #tpu.memory_space<vmem>>, vector<8x1xf32>
    %14 = vector.broadcast %13 : vector<8x1xf32> to vector<8x16xf32>
    %15 = arith.addf %12, %14 : vector<8x16xf32>
    %c0_11 = arith.constant 0 : index
    %c0_12 = arith.constant 0 : index
    %16 = vector.load %arg6[%c0_11, %c0_12] : memref<8x16xf32, #tpu.memory_space<vmem>>, vector<8x16xf32>
    tpu.vector_store %arg6[%c0_11, %c0_12], %15 {strides = array<i32>} : memref<8x16xf32, #tpu.memory_space<vmem>>, vector<8x16xf32>,
    return
  }
  func.func @transform_0(%arg0: i32) -> (i32, i32) {
    %c0_i32 = arith.constant 0 : i32
    %c0_i32_0 = arith.constant 0 : i32
    return %arg0, %c0_i32 : i32, i32
  }
  func.func @transform_1(%arg0: i32) -> (i32, i32) {
    %c0_i32 = arith.constant 0 : i32
    %c0_i32_0 = arith.constant 0 : i32
    %c0_i32_1 = arith.constant 0 : i32
    return %c0_i32, %c0_i32_0 : i32, i32
  }
  func.func @transform_2(%arg0: i32) -> (i32, i32) {
    %c0_i32 = arith.constant 0 : i32
    %c0_i32_0 = arith.constant 0 : i32
    %c0_i32_1 = arith.constant 0 : i32
    return %c0_i32, %c0_i32_0 : i32, i32
  }
  func.func @transform_3(%arg0: i32) -> (i32, i32) {
    %c0_i32 = arith.constant 0 : i32
    %c0_i32_0 = arith.constant 0 : i32
    %c0_i32_1 = arith.constant 0 : i32
    return %c0_i32, %c0_i32_0 : i32, i32
  }
  func.func @transform_4(%arg0: i32) -> (i32, i32) {
    %c0_i32 = arith.constant 0 : i32
    %c0_i32_0 = arith.constant 0 : i32
    %c0_i32_1 = arith.constant 0 : i32
    return %c0_i32, %c0_i32_0 : i32, i32
  }
  func.func @transform_5(%arg0: i32) -> (i32, i32) {
    %c0_i32 = arith.constant 0 : i32
    %c0_i32_0 = arith.constant 0 : i32
    return %c0_i32, %arg0 : i32, i32
  }
}

</mosaic_0001>

<bundles_post_ra>
// kernel: tpu_custom_call.1
= control target key start
LH: loop header
LB: loop body
LE: loop exit
PB: predicated region body
PF: predicated region fallthrough
CT: control target
= control target key end

     0   :  { %10 = vsyncpa [#allocation3], 0  ;;  %s900_s0 = inlined_call_operand.hbm [shape: f32[16,768], index: 0, kind: input, shape index: {}]   ;;  %s901_s1 = inlined_call_operand.hbm [shape: f32[768,128], index: 1, kind: input, shape index: {}]   ;;  %s902_s2 = inlined_call_operand.vmem [shape: f32[1,128], index: 2, kind: input, shape index: {}]   ;;  %s903_s3 = inlined_call_operand.vmem [shape: f32[8,128], index: 3, kind: input, shape index: {}]   ;;  %s904_s4 = inlined_call_operand.vmem [shape: f32[8,1], index: 4, kind: input, shape index: {}]   ;;  %s905_s5 = inlined_call_operand.hbm [shape: f32[8,16], index: 5, kind: output, shape index: {}]  }
   0x1   :  { %11 = vsyncpa [#allocation6], 0 }
   0x2   :  { %12 = vsyncpa [#allocation4], 0  ;;  %s814_s18 = smov [#allocation2]   ;;  %s742_s22 = scalar_lea.hbm %s900_s0, 1536 }
   0x3   :  { %s18_s19 = sshll.u32 %s814_s18, 4  ;;  %p743_p0 = scmp.ne.s32.totalorder %s900_s0, %s742_s22  ;;  %s19_s19 = int_to_ptr.vmem [resolvable:$true] %s18_s19 }
   0x4   :  { %p746_p1 = scmp.lt.u32.totalorder %s742_s22, %s900_s0 }
   0x6   :  { %p748_p2 = pnand %p746_p1, %p743_p0 }
   0x8   :  { %751 = shalt.err (!%p748_p2)
}
   0x9   :  { %s752_s27 = scalar_lea.vmem %s19_s19, 1536  ;;  %p757_p4 = scmp.lt.s32.totalorder %s19_s19, %s19_s19 }
   0xa   :  { %p753_p3 = scmp.ne.s32.totalorder %s19_s19, %s752_s27  ;;  %p758_p5 = scmp.lt.s32.totalorder %s752_s27, %s752_s27 }
   0xc   :  { %p759_p6 = por %p758_p5, %p757_p4 }
   0xe   :  { %p760_p7 = pnand %p759_p6, %p753_p3 }
  0x10   :  { %763 = shalt.err (!%p760_p7)
}
  0x11   :  { %s815_s28 = smov 768   ;;  %s816_s29 = smov 48  }
  0x12   :  { %24 = dma.hbm_to_vmem [thread:$0]  %s900_s0, 1536, %s19_s19, [#allocation3], %s815_s28, %s815_s28, %s816_s29  }
  0x13   :  { %s817_s7 = smov [#allocation5]   ;;  %s764_s11 = scalar_lea.hbm %s901_s1, 12288 }
  0x14   :  { %s30_s8 = sshll.u32 %s817_s7, 4  ;;  %p765_p8 = scmp.ne.s32.totalorder %s901_s1, %s764_s11  ;;  %s31_s8 = int_to_ptr.vmem [resolvable:$true] %s30_s8 }
  0x15   :  { %p768_p9 = scmp.lt.u32.totalorder %s764_s11, %s901_s1 }
  0x17   :  { %p770_p10 = pnand %p768_p9, %p765_p8 }
  0x19   :  { %773 = shalt.err (!%p770_p10)
}
  0x1a   :  { %s774_s16 = scalar_lea.vmem %s31_s8, 12288  ;;  %p779_p12 = scmp.lt.s32.totalorder %s31_s8, %s31_s8 }
  0x1b   :  { %p775_p11 = scmp.ne.s32.totalorder %s31_s8, %s774_s16  ;;  %p780_p13 = scmp.lt.s32.totalorder %s774_s16, %s774_s16 }
  0x1d   :  { %p781_p0 = por %p780_p13, %p779_p12 }
  0x1f   :  { %p782_p1 = pnand %p781_p0, %p775_p11 }
  0x21   :  { %785 = shalt.err (!%p782_p1)
}
  0x22   :  { %s818_s0 = smov 128   ;;  %s819_s17 = smov 8  }
  0x23   :  { %36 = dma.hbm_to_vmem [thread:$0]  %s901_s1, 12288, %s31_s8, [#allocation6], %s818_s0, %s818_s0, %s819_s17  }
  0x24   :  { %808 = dma.done.wait [#allocation3], 1536  }
  0x25   :  { %809 = vsyncadd [#allocation3], 4294965760 }
  0x26   :  { %810 = dma.done.wait [#allocation6], 12288  }
  0x27   :  { %811 = vsyncadd [#allocation6], 4294955008  ;;  %v77_v0 = vld [vmem:[#allocation5 + $0x80] sm:$0xff]  ;;  %v78_v1 = vld [vmem:[#allocation5 + $0x88] sm:$0xff]  ;;  %vm821_vm0 = vmmov 0   ;;  %s824_s23 = smov [#allocation7]  }
  0x28   :  { %v61_v2 = vld [vmem:[#allocation5] sm:$0xff]  ;;  %v623_v3 = vpack.c.bf16 %v78_v1, %v77_v0  ;;  %v62_v4 = vld [vmem:[#allocation5 + $0x8] sm:$0xff]  ;;  %v79_v11 = vld [vmem:[#allocation5 + $0x90] sm:$0xff]  ;;  %s486_s24 = sshll.u32 %s824_s23, 4  ;;  %vm478_vm1 = vcmask 130048   ;;  %s487_s24 = int_to_ptr.vmem [resolvable:$true] %s486_s24 }
  0x29   :  { %v109_v5 = vld [vmem:[#allocation5 + $0x180] sm:$0xff]  ;;  %v110_v6 = vld [vmem:[#allocation5 + $0x188] sm:$0xff]  ;;  %v625_v7 = vpack.c.bf16 %v62_v4, %v61_v2  ;;  %v80_v13 = vld [vmem:[#allocation5 + $0x98] sm:$0xff]  ;;  %s786_s25 = scalar_lea.vmem %s487_s24, 128  ;;  %p791_p3 = scmp.lt.s32.totalorder %s487_s24, %s487_s24 }
  0x2a   :  { %v655_v8 = vpack.c.bf16 %v110_v6, %v109_v5  ;;  %v93_v9 = vld [vmem:[#allocation5 + $0x100] sm:$0xff]  ;;  %v94_v10 = vld [vmem:[#allocation5 + $0x108] sm:$0xff]  ;;  %624 = vmatprep.subr.bf16.mxu0 %v623_v3  ;;  %v63_v14 = vld [vmem:[#allocation5 + $0x10] sm:$0xff]  ;;  %v627_v16 = vpack.c.bf16 %v80_v13, %v79_v11  ;;  %p787_p2 = scmp.ne.s32.totalorder %s487_s24, %s786_s25  ;;  %p792_p4 = scmp.lt.s32.totalorder %s786_s25, %s786_s25 }
  0x2b   :  { %v657_v12 = vpack.c.bf16 %v94_v10, %v93_v9  ;;  %v64_v15 = vld [vmem:[#allocation5 + $0x18] sm:$0xff]  ;;  %626 = vmatpush3.bf16.msra.mxu0 %v625_v7  ;;  %v111_v18 = vld [vmem:[#allocation5 + $0x190] sm:$0xff]  ;;  %v81_v23 = vld [vmem:[#allocation5 + $0xa0] sm:$0xff] }
  0x2c   :  { %656 = vmatprep.subr.bf16.mxu1 %v655_v8  ;;  %v629_v17 = vpack.c.bf16 %v64_v15, %v63_v14  ;;  %v112_v19 = vld [vmem:[#allocation5 + $0x198] sm:$0xff]  ;;  %v95_v20 = vld [vmem:[#allocation5 + $0x110] sm:$0xff]  ;;  %v82_v24 = vld [vmem:[#allocation5 + $0xa8] sm:$0xff]  ;;  %628 = vmatprep.subr.bf16.mxu0 %v627_v16  ;;  %p793_p5 = por %p792_p4, %p791_p3 }
  0x2d   :  { %658 = vmatpush3.bf16.msra.mxu1 %v657_v12  ;;  %v659_v21 = vpack.c.bf16 %v112_v19, %v111_v18  ;;  %v96_v22 = vld [vmem:[#allocation5 + $0x118] sm:$0xff]  ;;  %v631_v26 = vpack.c.bf16 %v82_v24, %v81_v23  ;;  %v65_v27 = vld [vmem:[#allocation5 + $0x20] sm:$0xff]  ;;  %v66_v28 = vld [vmem:[#allocation5 + $0x28] sm:$0xff] }
  0x2e   :  { %v661_v25 = vpack.c.bf16 %v96_v22, %v95_v20  ;;  %v113_v29 = vld [vmem:[#allocation5 + $0x1a0] sm:$0xff]  ;;  %v114_v30 = vld [vmem:[#allocation5 + $0x1a8] sm:$0xff]  ;;  %v633_v33 = vpack.c.bf16 %v66_v28, %v65_v27  ;;  %v83_v35 = vld [vmem:[#allocation5 + $0xb0] sm:$0xff]  ;;  %p794_p6 = pnand %p793_p5, %p787_p2 }
  0x2f   :  { %660 = vmatprep.subr.bf16.mxu1 %v659_v21  ;;  %v97_v31 = vld [vmem:[#allocation5 + $0x120] sm:$0xff]  ;;  %v98_v32 = vld [vmem:[#allocation5 + $0x128] sm:$0xff]  ;;  %630 = vmatpush3.bf16.msra.mxu0 %v629_v17  ;;  %v663_v34 = vpack.c.bf16 %v114_v30, %v113_v29  ;;  %v84_v36 = vld [vmem:[#allocation5 + $0xb8] sm:$0xff] }
  0x30   :  { %v67_v37 = vld [vmem:[#allocation5 + $0x30] sm:$0xff]  ;;  %632 = vmatprep.subr.bf16.mxu0 %v631_v26  ;;  %v665_v38 = vpack.c.bf16 %v98_v32, %v97_v31  ;;  %v635_v39 = vpack.c.bf16 %v84_v36, %v83_v35  ;;  %v68_v40 = vld [vmem:[#allocation5 + $0x38] sm:$0xff]  ;;  %v85_v46 = vld [vmem:[#allocation5 + $0xc0] sm:$0xff] }
  0x31   :  { %662 = vmatpush3.bf16.msra.mxu1 %v661_v25  ;;  %v115_v41 = vld [vmem:[#allocation5 + $0x1b0] sm:$0xff]  ;;  %v116_v42 = vld [vmem:[#allocation5 + $0x1b8] sm:$0xff]  ;;  %v86_v47 = vld [vmem:[#allocation5 + $0xc8] sm:$0xff]  ;;  %v637_v48 = vpack.c.bf16 %v68_v40, %v67_v37 }
  0x32   :  { %664 = vmatprep.subr.bf16.mxu1 %v663_v34  ;;  %v667_v43 = vpack.c.bf16 %v116_v42, %v115_v41  ;;  %v99_v44 = vld [vmem:[#allocation5 + $0x130] sm:$0xff]  ;;  %v100_v45 = vld [vmem:[#allocation5 + $0x138] sm:$0xff]  ;;  %v117_v49 = vld [vmem:[#allocation5 + $0x1c0] sm:$0xff]  ;;  %v639_v52 = vpack.c.bf16 %v86_v47, %v85_v46 }
  0x33   :  { %634 = vmatpush3.bf16.msra.mxu0 %v633_v33  ;;  %v118_v50 = vld [vmem:[#allocation5 + $0x1c8] sm:$0xff]  ;;  %v669_v51 = vpack.c.bf16 %v100_v45, %v99_v44  ;;  %v69_v53 = vld [vmem:[#allocation5 + $0x40] sm:$0xff]  ;;  %v87_v58 = vld [vmem:[#allocation5 + $0xd0] sm:$0xff] }
  0x34   :  { %636 = vmatprep.subr.bf16.mxu0 %v635_v39  ;;  %v70_v54 = vld [vmem:[#allocation5 + $0x48] sm:$0xff]  ;;  %v101_v55 = vld [vmem:[#allocation5 + $0x140] sm:$0xff]  ;;  %v671_v56 = vpack.c.bf16 %v118_v50, %v117_v49  ;;  %v88_v59 = vld [vmem:[#allocation5 + $0xd8] sm:$0xff] }
  0x35   :  { %666 = vmatpush3.bf16.msra.mxu1 %v665_v38  ;;  %v102_v57 = vld [vmem:[#allocation5 + $0x148] sm:$0xff]  ;;  %v119_v60 = vld [vmem:[#allocation5 + $0x1d0] sm:$0xff]  ;;  %v120_v61 = vld [vmem:[#allocation5 + $0x1d8] sm:$0xff]  ;;  %v641_v62 = vpack.c.bf16 %v70_v54, %v69_v53  ;;  %v643_v0 = vpack.c.bf16 %v88_v59, %v87_v58 }
  0x36   :  { %668 = vmatprep.subr.bf16.mxu1 %v667_v43  ;;  %v673_v63 = vpack.c.bf16 %v102_v57, %v101_v55  ;;  %v71_v1 = vld [vmem:[#allocation5 + $0x50] sm:$0xff]  ;;  %v72_v2 = vld [vmem:[#allocation5 + $0x58] sm:$0xff]  ;;  %v675_v4 = vpack.c.bf16 %v120_v61, %v119_v60  ;;  %v89_v6 = vld [vmem:[#allocation5 + $0xe0] sm:$0xff] }
  0x37   :  { %638 = vmatpush3.bf16.msra.mxu0 %v637_v48  ;;  %v103_v3 = vld [vmem:[#allocation5 + $0x150] sm:$0xff]  ;;  %v104_v5 = vld [vmem:[#allocation5 + $0x158] sm:$0xff]  ;;  %v90_v7 = vld [vmem:[#allocation5 + $0xe8] sm:$0xff]  ;;  %v645_v10 = vpack.c.bf16 %v72_v2, %v71_v1 }
  0x38   :  { %640 = vmatprep.subr.bf16.mxu0 %v639_v52  ;;  %v121_v8 = vld [vmem:[#allocation5 + $0x1e0] sm:$0xff]  ;;  %v122_v9 = vld [vmem:[#allocation5 + $0x1e8] sm:$0xff]  ;;  %v677_v13 = vpack.c.bf16 %v104_v5, %v103_v3  ;;  %v647_v14 = vpack.c.bf16 %v90_v7, %v89_v6  ;;  %v91_v19 = vld [vmem:[#allocation5 + $0xf0] sm:$0xff] }
  0x39   :  { %670 = vmatpush3.bf16.msra.mxu1 %v669_v51  ;;  %v73_v11 = vld [vmem:[#allocation5 + $0x60] sm:$0xff]  ;;  %v50_v12 = vld [vmem:[#allocation2 + $0x8] sm:$0xff]  ;;  %v679_v18 = vpack.c.bf16 %v122_v9, %v121_v8  ;;  %v92_v20 = vld [vmem:[#allocation5 + $0xf8] sm:$0xff] }
  0x3a   :  { %672 = vmatprep.subr.bf16.mxu1 %v671_v56  ;;  %v74_v15 = vld [vmem:[#allocation5 + $0x68] sm:$0xff]  ;;  %v105_v16 = vld [vmem:[#allocation5 + $0x160] sm:$0xff]  ;;  %228 = vmatprep.mubr.f32.mxu0 %v50_v12  ;;  %v52_v21 = vld [vmem:[#allocation2 + $0x18] sm:$0xff]  ;;  %v651_v26 = vpack.c.bf16 %v92_v20, %v91_v19 }
  0x3b   :  { %642 = vmatpush3.bf16.msra.mxu0 %v641_v62  ;;  %v106_v17 = vld [vmem:[#allocation5 + $0x168] sm:$0xff]  ;;  %v123_v22 = vld [vmem:[#allocation5 + $0x1f0] sm:$0xff]  ;;  %v124_v23 = vld [vmem:[#allocation5 + $0x1f8] sm:$0xff]  ;;  %303 = vmatprep.mubr.f32.mxu1 %v52_v21  ;;  %v649_v24 = vpack.c.bf16 %v74_v15, %v73_v11 }
  0x3c   :  { %644 = vmatprep.subr.bf16.mxu0 %v643_v0  ;;  %v681_v25 = vpack.c.bf16 %v106_v17, %v105_v16  ;;  %v75_v27 = vld [vmem:[#allocation5 + $0x70] sm:$0xff]  ;;  %v76_v28 = vld [vmem:[#allocation5 + $0x78] sm:$0xff]  ;;  %v683_v30 = vpack.c.bf16 %v124_v23, %v123_v22  ;;  %v141_v32 = vld [vmem:[#allocation5 + $0x280] sm:$0xff] }
  0x3d   :  { %674 = vmatpush3.bf16.msra.mxu1 %v673_v63  ;;  %v107_v29 = vld [vmem:[#allocation5 + $0x170] sm:$0xff]  ;;  %v108_v31 = vld [vmem:[#allocation5 + $0x178] sm:$0xff]  ;;  %v142_v33 = vld [vmem:[#allocation5 + $0x288] sm:$0xff]  ;;  %v653_v34 = vpack.c.bf16 %v76_v28, %v75_v27  ;;  %v820_v28 = vmov 0.0|0.0  }
  0x3e   :  { %676 = vmatprep.subr.bf16.mxu1 %v675_v4  ;;  %v685_v35 = vpack.c.bf16 %v108_v31, %v107_v29  ;;  %v687_v36 = vpack.c.bf16 %v142_v33, %v141_v32  ;;  %v125_v37 = vld [vmem:[#allocation5 + $0x200] sm:$0xff]  ;;  %v126_v38 = vld [vmem:[#allocation5 + $0x208] sm:$0xff]  ;;  %v143_v39 = vld [vmem:[#allocation5 + $0x290] sm:$0xff]  ;;  %v822_v29 = vmov 0.0   ;;  %v823_v31 = vmov 0  }
  0x3f   :  { %646 = vmatpush3.bf16.msra.mxu0 %v645_v10  ;;  %v144_v40 = vld [vmem:[#allocation5 + $0x298] sm:$0xff]  ;;  %v49_v41 = vld [vmem:[#allocation2] sm:$0xff]  ;;  %v689_v42 = vpack.c.bf16 %v126_v38, %v125_v37  ;;  %v51_v43 = vld [vmem:[#allocation2 + $0x10] sm:$0xff]  ;;  %733 = vset.pattern.permute.xlu0 %v823_v31 }
  0x40   :  { %648 = vmatprep.subr.bf16.mxu0 %v647_v14  ;;  %v691_v44 = vpack.c.bf16 %v144_v40, %v143_v39  ;;  %v127_v45 = vld [vmem:[#allocation5 + $0x210] sm:$0xff]  ;;  %v128_v46 = vld [vmem:[#allocation5 + $0x218] sm:$0xff]  ;;  %v145_v47 = vld [vmem:[#allocation5 + $0x2a0] sm:$0xff] }
  0x41   :  { %678 = vmatpush3.bf16.msra.mxu1 %v677_v13  ;;  %v146_v48 = vld [vmem:[#allocation5 + $0x2a8] sm:$0xff]  ;;  %v56_v49 = vld [vmem:[#allocation2 + $0x38] sm:$0xff]  ;;  %v693_v51 = vpack.c.bf16 %v128_v46, %v127_v45  ;;  %v55_v52 = vld [vmem:[#allocation2 + $0x30] sm:$0xff] }
  0x42   :  { %680 = vmatprep.subr.bf16.mxu1 %v679_v18  ;;  %v58_v50 = vld [vmem:[#allocation2 + $0x48] sm:$0xff]  ;;  %v695_v53 = vpack.c.bf16 %v146_v48, %v145_v47  ;;  %v129_v54 = vld [vmem:[#allocation5 + $0x220] sm:$0xff]  ;;  %v147_v57 = vld [vmem:[#allocation5 + $0x2b0] sm:$0xff] }
  0x43   :  { %650 = vmatpush3.bf16.msra.mxu0 %v649_v24  ;;  %v130_v55 = vld [vmem:[#allocation5 + $0x228] sm:$0xff]  ;;  %v57_v56 = vld [vmem:[#allocation2 + $0x40] sm:$0xff]  ;;  %v148_v58 = vld [vmem:[#allocation5 + $0x2b8] sm:$0xff] }
  0x44   :  { %652 = vmatprep.subr.bf16.mxu0 %v651_v26  ;;  %v54_v59 = vld [vmem:[#allocation2 + $0x28] sm:$0xff]  ;;  %v697_v60 = vpack.c.bf16 %v130_v55, %v129_v54  ;;  %v699_v61 = vpack.c.bf16 %v148_v58, %v147_v57  ;;  %v131_v62 = vld [vmem:[#allocation5 + $0x230] sm:$0xff]  ;;  %v132_v63 = vld [vmem:[#allocation5 + $0x238] sm:$0xff] }
  0x45   :  { %682 = vmatpush3.bf16.msra.mxu1 %v681_v25  ;;  %v149_v0 = vld [vmem:[#allocation5 + $0x2c0] sm:$0xff]  ;;  %v150_v1 = vld [vmem:[#allocation5 + $0x2c8] sm:$0xff]  ;;  %v701_v2 = vpack.c.bf16 %v132_v63, %v131_v62  ;;  %v151_v6 = vld [vmem:[#allocation5 + $0x2d0] sm:$0xff] }
  0x46   :  { %684 = vmatprep.subr.bf16.mxu1 %v683_v30  ;;  %v703_v3 = vpack.c.bf16 %v150_v1, %v149_v0  ;;  %v133_v4 = vld [vmem:[#allocation5 + $0x240] sm:$0xff]  ;;  %v134_v5 = vld [vmem:[#allocation5 + $0x248] sm:$0xff]  ;;  %v152_v7 = vld [vmem:[#allocation5 + $0x2d8] sm:$0xff] }
  0x47   :  { %654 = vmatpush3.bf16.msra.mxu0 %v653_v34  ;;  %v705_v8 = vpack.c.bf16 %v134_v5, %v133_v4  ;;  %v707_v9 = vpack.c.bf16 %v152_v7, %v151_v6  ;;  %v135_v10 = vld [vmem:[#allocation5 + $0x250] sm:$0xff]  ;;  %v136_v11 = vld [vmem:[#allocation5 + $0x258] sm:$0xff]  ;;  %v153_v12 = vld [vmem:[#allocation5 + $0x2e0] sm:$0xff] }
  0x48   :  { %688 = vmatprep.subr.bf16.mxu0 %v687_v36  ;;  %v154_v13 = vld [vmem:[#allocation5 + $0x2e8] sm:$0xff]  ;;  %v709_v14 = vpack.c.bf16 %v136_v11, %v135_v10  ;;  %v137_v16 = vld [vmem:[#allocation5 + $0x260] sm:$0xff]  ;;  %v155_v18 = vld [vmem:[#allocation5 + $0x2f0] sm:$0xff] }
  0x49   :  { %686 = vmatpush3.bf16.msra.mxu1 %v685_v35  ;;  %v711_v15 = vpack.c.bf16 %v154_v13, %v153_v12  ;;  %v138_v17 = vld [vmem:[#allocation5 + $0x268] sm:$0xff]  ;;  %v156_v19 = vld [vmem:[#allocation5 + $0x2f8] sm:$0xff]  ;;  %v139_v22 = vld [vmem:[#allocation5 + $0x270] sm:$0xff] }
  0x4a   :  { %229 = vmatmul.mubr.f32.vlgmr.msra.gmra.mrb[0].mxu0 %v49_v41  ;;  %v713_v20 = vpack.c.bf16 %v138_v17, %v137_v16  ;;  %v715_v21 = vpack.c.bf16 %v156_v19, %v155_v18  ;;  %v140_v23 = vld [vmem:[#allocation5 + $0x278] sm:$0xff]  ;;  %v53_v25 = vld [vmem:[#allocation2 + $0x20] sm:$0xff]  ;;  %v59_v27 = vld [vmem:[#allocation2 + $0x50] sm:$0xff]  ;;  %719 = vmatprep.subr.bf16.mxu1 %v820_v28 }
  0x4b   :  { %690 = vmatpush3.bf16.msra.mxu0 %v689_v42  ;;  %233 = vmatprep.mubr.f32.mxu0 %v56_v49  ;;  %v717_v24 = vpack.c.bf16 %v140_v23, %v139_v22  ;;  %v60_v26 = vld [vmem:[#allocation2 + $0x58] sm:$0xff]  ;;  %v402_v30 = vld [vmem:[%s904_s4] sm:$0xff] }
  0x4c   :  { %304 = vmatmul.mubr.f32.vlgmr.msra.gmra.mrb[0].mxu1 %v51_v43  ;;  %692 = vmatprep.subr.bf16.mxu0 %v691_v44  ;;  %v496_v33 = vld [vmem:[%s902_s2] ss:$0 sm:$0xff] }
  0x4d   :  { %308 = vmatprep.mubr.f32.mxu1 %v58_v50  ;;  %405 = vperm.xlu0 %733, %v402_v30  }
  0x4e   :  { %234 = vmatmul.mubr.f32.gmra.mrb[2].mxu0 %v55_v52 }
  0x4f   :  { %694 = vmatpush3.bf16.msra.mxu0 %v693_v51  ;;  %378 = vmatprep.mubr.f32.mxu0 %v54_v59 }
  0x50   :  { %309 = vmatmul.mubr.f32.gmra.mrb[2].mxu1 %v57_v56  ;;  %696 = vmatprep.subr.bf16.mxu0 %v695_v53 }
  0x51   :  { %620 = vmatprep.mubr.msk.f32.mxu1 %vm821_vm0, %v822_v29 }
  0x53   :  { %698 = vmatpush3.bf16.msra.mxu0 %v697_v60 }
  0x54   :  { %700 = vmatprep.subr.bf16.mxu0 %v699_v61 }
  0x57   :  { %702 = vmatpush3.bf16.msra.mxu0 %v701_v2  ;;  %v401_v2 = vld [vmem:[%s903_s3] sm:$0xff] }
  0x58   :  { %704 = vmatprep.subr.bf16.mxu0 %v703_v3 }
  0x5b   :  { %706 = vmatpush3.bf16.msra.mxu0 %v705_v8 }
  0x5c   :  { %708 = vmatprep.subr.bf16.mxu0 %v707_v9 }
  0x5f   :  { %710 = vmatpush3.bf16.msra.mxu0 %v709_v14 }
  0x60   :  { %712 = vmatprep.subr.bf16.mxu0 %v711_v15 }
  0x63   :  { %714 = vmatpush3.bf16.msra.mxu0 %v713_v20 }
  0x64   :  { %716 = vmatprep.subr.bf16.mxu0 %v715_v21 }
  0x67   :  { %718 = vmatpush3.bf16.msra.mxu0 %v717_v24 }
  0x6a   :  { %379 = vmatmul.mubr.f32.vlgmr.msra.gmra.mrb[4].mxu0 %v53_v25 }
  0x6b   :  { %383 = vmatprep.mubr.f32.mxu0 %v60_v26 }
  0x6e   :  { %384 = vmatmul.mubr.f32.gmra.mrb[6].mxu0 %v59_v27 }
  0xcc   :  { %v406_v3 = vpop.permute.xlu0 %405 }
 0x11d   :  { %v531_v32 = vpop.f32.mrb[0].mxu0 }
 0x11e   :  { %v532_v34 = vpop.f32.mrb[1].mxu0 }
 0x11f   :  { %v569_v35 = vpop.f32.mrb[0].mxu1  ;;  %v533_v36 = vadd.f32 %v532_v34, %v531_v32 }
 0x120   :  { %v570_v37 = vpop.f32.mrb[1].mxu1 }
 0x121   :  { %v571_v38 = vadd.f32 %v570_v37, %v569_v35  ;;  %v231_v39 = vadd.f32 %v533_v36, %v496_v33  ;;  %v534_v40 = vpop.f32.mrb[2].mxu0 }
 0x122   :  { %v535_v41 = vpop.f32.mrb[3].mxu0 }
 0x123   :  { %v572_v42 = vpop.f32.mrb[2].mxu1  ;;  %v306_v43 = vadd.f32 %v571_v38, %v231_v39  ;;  %v536_v44 = vadd.f32 %v535_v41, %v534_v40 }
 0x124   :  { %v573_v45 = vpop.f32.mrb[3].mxu1 }
 0x125   :  { %v574_v46 = vadd.f32 %v573_v45, %v572_v42  ;;  %v236_v47 = vadd.f32 %v536_v44, %v496_v33 }
 0x127   :  { %v311_v48 = vadd.f32 %v574_v46, %v236_v47 }
 0x13d   :  { %v607_v49 = vpop.f32.mrb[4].mxu0 }
 0x13e   :  { %v608_v50 = vpop.f32.mrb[5].mxu0 }
 0x13f   :  { %v609_v51 = vadd.f32 %v608_v50, %v607_v49 }
 0x141   :  { %v381_v52 = vadd.f32 %v609_v51, %v306_v43  ;;  %v610_v53 = vpop.f32.mrb[6].mxu0 }
 0x142   :  { %v611_v54 = vpop.f32.mrb[7].mxu0 }
 0x143   :  { %v497_v55 = vmul.f32 -1.442695, %v381_v52  ;;  %v612_v56 = vadd.f32 %v611_v54, %v610_v53 }
 0x145   :  { %734 = vpow2.f32 %v497_v55  ;;  %v386_v57 = vadd.f32 %v612_v56, %v311_v48 }
 0x147   :  { %v498_v58 = vmul.f32 -1.442695, %v386_v57 }
 0x149   :  { %736 = vpow2.f32 %v498_v58 }
 0x14f   :  { %v735_v59 = vpop.eup %734 }
 0x150   :  { %v395_v60 = vadd.f32 1.0, %v735_v59 }
 0x152   :  { %738 = vrcp.f32 %v395_v60 }
 0x153   :  { %v737_v61 = vpop.eup %736 }
 0x154   :  { %v396_v62 = vadd.f32 1.0, %v737_v61 }
 0x156   :  { %740 = vrcp.f32 %v396_v62 }
 0x15c   :  { %v739_v63 = vpop.eup %738 }
 0x160   :  { %v741_v0 = vpop.eup %740 }
 0x161   :  { %v720_v1 = vpack.c.bf16 %v741_v0, %v739_v63 }
 0x163   :  { %721 = vmatpush3.bf16.xpose.msra.mxu1 %v720_v1 }
 0x16a   :  { %621 = vmatmul.mubr.f32.vlgmr.msra.gmra.mrb[4].mxu1 %v401_v2 }
 0x23d   :  { %v474_v4 = vpop.f32.mrb[4].mxu1 }
 0x23e   :  { %v475_v5 = vadd.f32 %v474_v4, %v406_v3  ;;  %v622_v6 = vpop.f32.mrb[5].mxu1 }
 0x240   :  { %479 = vst.msk [vmem:[#allocation7] sm:$0xff] %vm478_vm1, %v475_v5 }
 0x241   :  { %797 = shalt.err (!%p794_p6)
}
 0x242   :  { %s798_s3 = scalar_lea.hbm %s905_s5, 128 }
 0x243   :  { %p799_p7 = scmp.ne.s32.totalorder %s905_s5, %s798_s3  ;;  %p802_p8 = scmp.lt.u32.totalorder %s798_s3, %s905_s5 }
 0x245   :  { %p804_p9 = pnand %p802_p8, %p799_p7 }
 0x247   :  { %807 = shalt.err (!%p804_p9)
}
 0x248   :  { %489 = dma.vmem_to_hbm [thread:$0]  %s487_s24, 128, %s905_s5, [#allocation4]  }
 0x249   :  { %812 = dma.done.wait [#allocation4], 128  }
 0x24a   :  { %813 = vsyncadd [#allocation4], 4294967168 }
 0x24b   :  { %493 = vsyncpa [#allocation3], 1 }
 0x24c   :  { %494 = vsyncpa [#allocation6], 1 }
 0x24d   :  { %495 = vsyncpa [#allocation4], 1 }

</bundles_post_ra>
